<compile_context>
chip_gen: v5e
topology: v5e:2x2
jax: 0.10.0
libtpu: 0.0.40
codegen_flags: <defaults>
</compile_context>

<pallas_src>
import functools

import jax
import jax.numpy as jnp
from jax import lax
from jax.experimental import pallas as pl
from jax.experimental.pallas import tpu as pltpu


def _resblock_kernel(x_ref, w1_ref, w2_ref, out_ref, buf_ref, patch_ref, *,
                     H, W, B, pad):
    # x_ref    : (B, C, H*W)          B images; channels on sublanes, H*W on lanes
    # w1_ref   : (C,    9*C)          conv1 im2col weights (col t*C+ci <-> tap t, chan ci)
    # w2_ref   : (Cout, 9*C)          conv2 im2col weights
    # out_ref  : (B, Cout, H*W)
    # buf_ref  : (2, C, H*W + 2*pad)  lane-padded f32 scratch (2 slots), pad >= W+1
    # patch_ref: (2, 9*C, H*W)        im2col patch scratch (2 slots)
    HW = H * W
    C = x_ref.shape[1]

    # ---- once per grid step (amortized over B images) ----------------------
    # Re-zero only the halo slabs of both slots (cheap, core-sharding safe);
    # interiors are fully rewritten below before every read.
    halo = jnp.zeros((2, C, pad), jnp.float32)
    buf_ref[:, :, :pad] = halo
    buf_ref[:, :, pad + HW:] = halo

    # Column-validity masks for the horizontal taps (shared by both convs and
    # all B images of this block).
    col = lax.broadcasted_iota(jnp.int32, (C, HW), 1) % W
    ok_left = (col != 0).astype(jnp.float32)        # tap dx = -1
    ok_right = (col != W - 1).astype(jnp.float32)   # tap dx = +1

    def build_patch(v, slot):
        # v: (C, HW) f32 activation -> (9*C, HW) im2col patch in patch_ref[slot].
        buf_ref[slot, :, pad:pad + HW] = v          # aligned interior write
        t = 0
        for dy in (-1, 0, 1):
            for dx in (-1, 0, 1):
                start = pad + dy * W + dx           # static lane offset
                s = buf_ref[slot, :, start:start + HW]
                if dx == -1:
                    s = s * ok_left                 # kill wrapped columns
                elif dx == 1:
                    s = s * ok_right
                patch_ref[slot, t * C:(t + 1) * C, :] = s
                t += 1

    w1 = w1_ref[...]                                # hoisted: resident weights
    w2 = w2_ref[...]

    # ---- per-image work, statically unrolled over the B images -------------
    # Equivalent to a batched einsum over B; per-image (C,9C)x(9C,HW) matmuls
    # keep the MXU operands vreg-sized (no spills).  2-deep scratch slots let
    # adjacent images' patch builds / matmuls overlap.
    for b in range(B):
        slot = b & 1
        xb = x_ref[b].astype(jnp.float32)           # (C, HW)

        build_patch(xb, slot)
        h = jnp.dot(w1, patch_ref[slot], preferred_element_type=jnp.float32)
        h = jnp.maximum(h, 0.0)                     # conv1 + ReLU

        build_patch(h, slot)
        y = jnp.dot(w2, patch_ref[slot], preferred_element_type=jnp.float32)

        # Residual add; lane-dense (HW multiple of 128) unmasked store.
        out_ref[b] = (xb + y).astype(out_ref.dtype)


def _pick_batch_block(N, C, HW, pad):
    """Images per grid step: amortize per-step overhead, stay VMEM-safe,
    keep >= 2 grid steps when N >= 2 (so both v7x TensorCores get work)."""
    budget = 20 * 1024 * 1024                       # safe even for v7x (64 MiB phys)
    fixed = (2 * C * (HW + 2 * pad)                 # buf scratch (2 slots)
             + 2 * 9 * C * HW                       # patch scratch (2 slots)
             + 4 * C * 9 * C) * 4                   # weights, double-buffered
    per_image = 4 * C * HW * 4                      # in + out, double-buffered
    cap = max(1, (budget - fixed) // per_image)
    cap = min(cap, 32)                              # bound unrolled kernel size
    if N >= 2:
        cap = min(cap, N // 2)                      # grid length >= 2 (megacore)
    cap = max(int(cap), 1)
    best = 1
    for d in range(1, cap + 1):                     # largest divisor of N <= cap
        if N % d == 0:                              # (keeps blocks exact; no
            best = d                                #  partial-block masking needed)
    return best


@jax.jit
def resblock_forward(x_nchw, w1_oihw, w2_oihw):
    """ResBlock forward: x + conv2(relu(conv1(x))). NCHW in / NCHW out.

    x_nchw : (N, C, H, W);  w?_oihw : (Cout, Cin, 3, 3) PyTorch layout, no bias.
    """
    N, C, H, W = x_nchw.shape
    Cout = w2_oihw.shape[0]
    if Cout != C or w1_oihw.shape[:2] != (C, C) or w2_oihw.shape[1] != C:
        raise ValueError("ResBlock residual add requires in_channels == out_channels")
    HW = H * W
    # Lane-aligned halo wide enough for a +/-(W+1) flat shift.
    pad = max(128, ((W + 1 + 127) // 128) * 128)

    B = _pick_batch_block(N, C, HW, pad)            # images per grid step
    G = N // B

    # NCHW already has channels-then-spatial: flattening (H, W) -> H*W is free.
    x_flat = x_nchw.reshape(N, C, HW)
    # OIHW -> (O, Ky, Kx, I) -> (O, 9*I): column order matches the in-kernel
    # patch row order (tap-major, channel-minor). Tiny one-time transform;
    # pre-cast so no per-step dtype work happens in the kernel.
    w1m = jnp.transpose(w1_oihw, (0, 2, 3, 1)).reshape(C, 9 * C).astype(jnp.float32)
    w2m = jnp.transpose(w2_oihw, (0, 2, 3, 1)).reshape(Cout, 9 * C).astype(jnp.float32)

    kernel = functools.partial(_resblock_kernel, H=H, W=W, B=B, pad=pad)

    out_flat = pl.pallas_call(
        kernel,
        out_shape=jax.ShapeDtypeStruct((N, Cout, HW), x_nchw.dtype),
        grid_spec=pltpu.PrefetchScalarGridSpec(
            num_scalar_prefetch=0,
            grid=(G,),  # batch-block axis; "parallel" shards across TCs (v7x)
            in_specs=[
                pl.BlockSpec((B, C, HW), lambda g: (g, 0, 0)),
                pl.BlockSpec((C, 9 * C), lambda g: (0, 0)),       # resident weights
                pl.BlockSpec((Cout, 9 * C), lambda g: (0, 0)),
            ],
            out_specs=pl.BlockSpec((B, Cout, HW), lambda g: (g, 0, 0)),
            scratch_shapes=[
                pltpu.VMEM((2, C, HW + 2 * pad), jnp.float32),    # halo buffers
                pltpu.VMEM((2, 9 * C, HW), jnp.float32),          # im2col patches
            ],
        ),
        compiler_params=pltpu.CompilerParams(
            dimension_semantics=("parallel",),
            # Batched blocks can exceed v5e's 16 MiB scoped default; stay well
            # under v7x's 64 MiB physical VMEM.
            vmem_limit_bytes=40 * 1024 * 1024,
        ),
    )(x_flat, w1m, w2m)

    return out_flat.reshape(N, Cout, H, W)


def _reference_forward(x_nchw, w1_oihw, w2_oihw):
    """Pure-JAX reference (matches PyTorch semantics) for verification."""
    dn = lax.conv_dimension_numbers(x_nchw.shape, w1_oihw.shape,
                                    ("NCHW", "OIHW", "NCHW"))
    h = lax.conv_general_dilated(x_nchw, w1_oihw, (1, 1), ((1, 1), (1, 1)),
                                 dimension_numbers=dn)
    h = jnp.maximum(h, 0.0)
    y = lax.conv_general_dilated(h, w2_oihw, (1, 1), ((1, 1), (1, 1)),
                                 dimension_numbers=dn)
    return x_nchw + y


if __name__ == "__main__":
    key = jax.random.PRNGKey(0)
    kx, kw1, kw2, kx2 = jax.random.split(key, 4)

    # Primary small test (B = 1 per step, grid of 2 -> both v7x TCs busy).
    N, C, H, W = 2, 8, 16, 16
    x = jax.random.normal(kx, (N, C, H, W), dtype=jnp.float32)
    w1 = jax.random.normal(kw1, (C, C, 3, 3), dtype=jnp.float32) * 0.1
    w2 = jax.random.normal(kw2, (C, C, 3, 3), dtype=jnp.float32) * 0.1

    out = jax.block_until_ready(resblock_forward(x, w1, w2))
    ref = _reference_forward(x, w1, w2)
    assert out.shape == ref.shape == (N, C, H, W)
    err = float(jnp.max(jnp.abs(out - ref)))
    assert err < 1e-4, err

    # Secondary test exercising the batched path (N=8 -> B=4, grid of 2).
    N2 = 8
    x2 = jax.random.normal(kx2, (N2, C, H, W), dtype=jnp.float32)
    out2 = jax.block_until_ready(resblock_forward(x2, w1, w2))
    ref2 = _reference_forward(x2, w1, w2)
    err2 = float(jnp.max(jnp.abs(out2 - ref2)))
    assert err2 < 1e-4, err2

    print("KERNEL_OK")
</pallas_src>

<mosaic_0001>
module attributes {stable_mosaic.version = 11 : i64} {
  func.func @_resblock_kernel(%arg0: i32, %arg1: memref<1x8x256xf32, #tpu.memory_space<vmem>>, %arg2: memref<8x72xf32, #tpu.memory_space<vmem>>, %arg3: memref<8x72xf32, #tpu.memory_space<vmem>>, %arg4: memref<1x8x256xf32, #tpu.memory_space<vmem>>, %arg5: memref<2x8x512xf32, #tpu.memory_space<vmem>>, %arg6: memref<2x72x256xf32, #tpu.memory_space<vmem>>) attributes {dimension_semantics = [#tpu.dimension_semantics<parallel>], iteration_bounds = array<i64: 2>, scalar_prefetch = 0 : i64, scratch_operands = 2 : i64, tpu.core_type = #tpu.core_type<tc>, window_params = [{transform_indices = @transform_0, window_bounds = array<i64: 1, 8, 256>}, {pipeline_mode = #tpu.pipeline_mode<synchronous>, transform_indices = @transform_1, window_bounds = array<i64: 8, 72>}, {pipeline_mode = #tpu.pipeline_mode<synchronous>, transform_indices = @transform_2, window_bounds = array<i64: 8, 72>}, {transform_indices = @transform_3, window_bounds = array<i64: 1, 8, 256>}]} {
    %cst = arith.constant 0.000000e+00 : f32
    %0 = vector.broadcast %cst : f32 to vector<2x8x128xf32>
    %c0 = arith.constant 0 : index
    %c0_0 = arith.constant 0 : index
    %c0_1 = arith.constant 0 : index
    %1 = vector.load %arg5[%c0, %c0_0, %c0_1] : memref<2x8x512xf32, #tpu.memory_space<vmem>>, vector<2x8x128xf32>
    tpu.vector_store %arg5[%c0, %c0_0, %c0_1], %0 {strides = array<i32>} : memref<2x8x512xf32, #tpu.memory_space<vmem>>, vector<2x8x128xf32>,
    %c0_2 = arith.constant 0 : index
    %c0_3 = arith.constant 0 : index
    %c384 = arith.constant 384 : index
    %2 = vector.load %arg5[%c0_2, %c0_3, %c384] : memref<2x8x512xf32, #tpu.memory_space<vmem>>, vector<2x8x128xf32>
    tpu.vector_store %arg5[%c0_2, %c0_3, %c384], %0 {strides = array<i32>} : memref<2x8x512xf32, #tpu.memory_space<vmem>>, vector<2x8x128xf32>,
    %3 = tpu.iota {dimensions = array<i32: 1>} : vector<8x256xi32>
    %c16_i32 = arith.constant 16 : i32
    %c0_i32 = arith.constant 0 : i32
    %4 = arith.cmpi eq, %c16_i32, %c0_i32 : i32
    %c1_i32 = arith.constant 1 : i32
    %5 = arith.select %4, %c1_i32, %c16_i32 : i32
    %6 = vector.broadcast %5 : i32 to vector<8x256xi32>
    %7 = arith.remsi %3, %6 : vector<8x256xi32>
    %c0_i32_4 = arith.constant 0 : i32
    %8 = vector.broadcast %c0_i32_4 : i32 to vector<8x256xi32>
    %9 = arith.cmpi ne, %7, %8 : vector<8x256xi32>
    %c0_i32_5 = arith.constant 0 : i32
    %10 = vector.broadcast %c0_i32_5 : i32 to vector<8x256xi32>
    %11 = arith.cmpi slt, %7, %10 : vector<8x256xi32>
    %c0_i32_6 = arith.constant 0 : i32
    %12 = arith.cmpi slt, %5, %c0_i32_6 : i32
    %13 = vector.broadcast %12 : i1 to vector<8x256xi1>
    %14 = vector.broadcast %13 : vector<8x256xi1> to vector<8x256xi1>
    %15 = arith.xori %11, %14 : vector<8x256xi1>
    %16 = arith.andi %15, %9 : vector<8x256xi1>
    %17 = vector.broadcast %5 : i32 to vector<8x256xi32>
    %18 = arith.addi %7, %17 : vector<8x256xi32>
    %19 = arith.select %16, %18, %7 : vector<8x256xi1>, vector<8x256xi32>
    %c0_i32_7 = arith.constant 0 : i32
    %20 = vector.broadcast %c0_i32_7 : i32 to vector<8x256xi32>
    %21 = arith.cmpi ne, %19, %20 : vector<8x256xi32>
    %22 = arith.extui %21 : vector<8x256xi1> to vector<8x256xi32>
    %23 = arith.sitofp %22 : vector<8x256xi32> to vector<8x256xf32>
    %c15_i32 = arith.constant 15 : i32
    %24 = vector.broadcast %c15_i32 : i32 to vector<8x256xi32>
    %25 = arith.cmpi ne, %19, %24 : vector<8x256xi32>
    %26 = arith.extui %25 : vector<8x256xi1> to vector<8x256xi32>
    %27 = arith.sitofp %26 : vector<8x256xi32> to vector<8x256xf32>
    %c0_8 = arith.constant 0 : index
    %c0_9 = arith.constant 0 : index
    %28 = vector.load %arg2[%c0_8, %c0_9] : memref<8x72xf32, #tpu.memory_space<vmem>>, vector<8x72xf32>
    %c0_10 = arith.constant 0 : index
    %c0_11 = arith.constant 0 : index
    %29 = vector.load %arg3[%c0_10, %c0_11] : memref<8x72xf32, #tpu.memory_space<vmem>>, vector<8x72xf32>
    %c0_12 = arith.constant 0 : index
    %c0_13 = arith.constant 0 : index
    %c0_14 = arith.constant 0 : index
    %30 = vector.load %arg1[%c0_12, %c0_13, %c0_14] : memref<1x8x256xf32, #tpu.memory_space<vmem>>, vector<1x8x256xf32>
    %31 = vector.shape_cast %30 : vector<1x8x256xf32> to vector<8x256xf32>
    %c0_15 = arith.constant 0 : index
    %c0_16 = arith.constant 0 : index
    %c128 = arith.constant 128 : index
    %32 = vector.load %arg5[%c0_15, %c0_16, %c128] : memref<2x8x512xf32, #tpu.memory_space<vmem>>, vector<1x8x256xf32>
    %33 = vector.shape_cast %32 : vector<1x8x256xf32> to vector<8x256xf32>
    %34 = vector.shape_cast %31 : vector<8x256xf32> to vector<1x8x256xf32>
    tpu.vector_store %arg5[%c0_15, %c0_16, %c128], %34 {strides = array<i32>} : memref<2x8x512xf32, #tpu.memory_space<vmem>>, vector<1x8x256xf32>,
    %c0_17 = arith.constant 0 : index
    %c0_18 = arith.constant 0 : index
    %c111 = arith.constant 111 : index
    %35 = vector.load %arg5[%c0_17, %c0_18, %c111] : memref<2x8x512xf32, #tpu.memory_space<vmem>>, vector<1x8x256xf32>
    %36 = vector.shape_cast %35 : vector<1x8x256xf32> to vector<8x256xf32>
    %37 = arith.mulf %36, %23 : vector<8x256xf32>
    %c0_19 = arith.constant 0 : index
    %c0_20 = arith.constant 0 : index
    %c0_21 = arith.constant 0 : index
    %38 = vector.load %arg6[%c0_19, %c0_20, %c0_21] : memref<2x72x256xf32, #tpu.memory_space<vmem>>, vector<1x8x256xf32>
    %39 = vector.shape_cast %38 : vector<1x8x256xf32> to vector<8x256xf32>
    %40 = vector.shape_cast %37 : vector<8x256xf32> to vector<1x8x256xf32>
    tpu.vector_store %arg6[%c0_19, %c0_20, %c0_21], %40 {strides = array<i32>} : memref<2x72x256xf32, #tpu.memory_space<vmem>>, vector<1x8x256xf32>,
    %c0_22 = arith.constant 0 : index
    %c0_23 = arith.constant 0 : index
    %c112 = arith.constant 112 : index
    %41 = vector.load %arg5[%c0_22, %c0_23, %c112] : memref<2x8x512xf32, #tpu.memory_space<vmem>>, vector<1x8x256xf32>
    %42 = vector.shape_cast %41 : vector<1x8x256xf32> to vector<8x256xf32>
    %c0_24 = arith.constant 0 : index
    %c8 = arith.constant 8 : index
    %c0_25 = arith.constant 0 : index
    %43 = vector.load %arg6[%c0_24, %c8, %c0_25] : memref<2x72x256xf32, #tpu.memory_space<vmem>>, vector<1x8x256xf32>
    %44 = vector.shape_cast %43 : vector<1x8x256xf32> to vector<8x256xf32>
    %45 = vector.shape_cast %42 : vector<8x256xf32> to vector<1x8x256xf32>
    tpu.vector_store %arg6[%c0_24, %c8, %c0_25], %45 {strides = array<i32>} : memref<2x72x256xf32, #tpu.memory_space<vmem>>, vector<1x8x256xf32>,
    %c0_26 = arith.constant 0 : index
    %c0_27 = arith.constant 0 : index
    %c113 = arith.constant 113 : index
    %46 = vector.load %arg5[%c0_26, %c0_27, %c113] : memref<2x8x512xf32, #tpu.memory_space<vmem>>, vector<1x8x256xf32>
    %47 = vector.shape_cast %46 : vector<1x8x256xf32> to vector<8x256xf32>
    %48 = arith.mulf %47, %27 : vector<8x256xf32>
    %c0_28 = arith.constant 0 : index
    %c16 = arith.constant 16 : index
    %c0_29 = arith.constant 0 : index
    %49 = vector.load %arg6[%c0_28, %c16, %c0_29] : memref<2x72x256xf32, #tpu.memory_space<vmem>>, vector<1x8x256xf32>
    %50 = vector.shape_cast %49 : vector<1x8x256xf32> to vector<8x256xf32>
    %51 = vector.shape_cast %48 : vector<8x256xf32> to vector<1x8x256xf32>
    tpu.vector_store %arg6[%c0_28, %c16, %c0_29], %51 {strides = array<i32>} : memref<2x72x256xf32, #tpu.memory_space<vmem>>, vector<1x8x256xf32>,
    %c0_30 = arith.constant 0 : index
    %c0_31 = arith.constant 0 : index
    %c127 = arith.constant 127 : index
    %52 = vector.load %arg5[%c0_30, %c0_31, %c127] : memref<2x8x512xf32, #tpu.memory_space<vmem>>, vector<1x8x256xf32>
    %53 = vector.shape_cast %52 : vector<1x8x256xf32> to vector<8x256xf32>
    %54 = arith.mulf %53, %23 : vector<8x256xf32>
    %c0_32 = arith.constant 0 : index
    %c24 = arith.constant 24 : index
    %c0_33 = arith.constant 0 : index
    %55 = vector.load %arg6[%c0_32, %c24, %c0_33] : memref<2x72x256xf32, #tpu.memory_space<vmem>>, vector<1x8x256xf32>
    %56 = vector.shape_cast %55 : vector<1x8x256xf32> to vector<8x256xf32>
    %57 = vector.shape_cast %54 : vector<8x256xf32> to vector<1x8x256xf32>
    tpu.vector_store %arg6[%c0_32, %c24, %c0_33], %57 {strides = array<i32>} : memref<2x72x256xf32, #tpu.memory_space<vmem>>, vector<1x8x256xf32>,
    %c0_34 = arith.constant 0 : index
    %c0_35 = arith.constant 0 : index
    %c128_36 = arith.constant 128 : index
    %58 = vector.load %arg5[%c0_34, %c0_35, %c128_36] : memref<2x8x512xf32, #tpu.memory_space<vmem>>, vector<1x8x256xf32>
    %59 = vector.shape_cast %58 : vector<1x8x256xf32> to vector<8x256xf32>
    %c0_37 = arith.constant 0 : index
    %c32 = arith.constant 32 : index
    %c0_38 = arith.constant 0 : index
    %60 = vector.load %arg6[%c0_37, %c32, %c0_38] : memref<2x72x256xf32, #tpu.memory_space<vmem>>, vector<1x8x256xf32>
    %61 = vector.shape_cast %60 : vector<1x8x256xf32> to vector<8x256xf32>
    %62 = vector.shape_cast %59 : vector<8x256xf32> to vector<1x8x256xf32>
    tpu.vector_store %arg6[%c0_37, %c32, %c0_38], %62 {strides = array<i32>} : memref<2x72x256xf32, #tpu.memory_space<vmem>>, vector<1x8x256xf32>,
    %c0_39 = arith.constant 0 : index
    %c0_40 = arith.constant 0 : index
    %c129 = arith.constant 129 : index
    %63 = vector.load %arg5[%c0_39, %c0_40, %c129] : memref<2x8x512xf32, #tpu.memory_space<vmem>>, vector<1x8x256xf32>
    %64 = vector.shape_cast %63 : vector<1x8x256xf32> to vector<8x256xf32>
    %65 = arith.mulf %64, %27 : vector<8x256xf32>
    %c0_41 = arith.constant 0 : index
    %c40 = arith.constant 40 : index
    %c0_42 = arith.constant 0 : index
    %66 = vector.load %arg6[%c0_41, %c40, %c0_42] : memref<2x72x256xf32, #tpu.memory_space<vmem>>, vector<1x8x256xf32>
    %67 = vector.shape_cast %66 : vector<1x8x256xf32> to vector<8x256xf32>
    %68 = vector.shape_cast %65 : vector<8x256xf32> to vector<1x8x256xf32>
    tpu.vector_store %arg6[%c0_41, %c40, %c0_42], %68 {strides = array<i32>} : memref<2x72x256xf32, #tpu.memory_space<vmem>>, vector<1x8x256xf32>,
    %c0_43 = arith.constant 0 : index
    %c0_44 = arith.constant 0 : index
    %c143 = arith.constant 143 : index
    %69 = vector.load %arg5[%c0_43, %c0_44, %c143] : memref<2x8x512xf32, #tpu.memory_space<vmem>>, vector<1x8x256xf32>
    %70 = vector.shape_cast %69 : vector<1x8x256xf32> to vector<8x256xf32>
    %71 = arith.mulf %70, %23 : vector<8x256xf32>
    %c0_45 = arith.constant 0 : index
    %c48 = arith.constant 48 : index
    %c0_46 = arith.constant 0 : index
    %72 = vector.load %arg6[%c0_45, %c48, %c0_46] : memref<2x72x256xf32, #tpu.memory_space<vmem>>, vector<1x8x256xf32>
    %73 = vector.shape_cast %72 : vector<1x8x256xf32> to vector<8x256xf32>
    %74 = vector.shape_cast %71 : vector<8x256xf32> to vector<1x8x256xf32>
    tpu.vector_store %arg6[%c0_45, %c48, %c0_46], %74 {strides = array<i32>} : memref<2x72x256xf32, #tpu.memory_space<vmem>>, vector<1x8x256xf32>,
    %c0_47 = arith.constant 0 : index
    %c0_48 = arith.constant 0 : index
    %c144 = arith.constant 144 : index
    %75 = vector.load %arg5[%c0_47, %c0_48, %c144] : memref<2x8x512xf32, #tpu.memory_space<vmem>>, vector<1x8x256xf32>
    %76 = vector.shape_cast %75 : vector<1x8x256xf32> to vector<8x256xf32>
    %c0_49 = arith.constant 0 : index
    %c56 = arith.constant 56 : index
    %c0_50 = arith.constant 0 : index
    %77 = vector.load %arg6[%c0_49, %c56, %c0_50] : memref<2x72x256xf32, #tpu.memory_space<vmem>>, vector<1x8x256xf32>
    %78 = vector.shape_cast %77 : vector<1x8x256xf32> to vector<8x256xf32>
    %79 = vector.shape_cast %76 : vector<8x256xf32> to vector<1x8x256xf32>
    tpu.vector_store %arg6[%c0_49, %c56, %c0_50], %79 {strides = array<i32>} : memref<2x72x256xf32, #tpu.memory_space<vmem>>, vector<1x8x256xf32>,
    %c0_51 = arith.constant 0 : index
    %c0_52 = arith.constant 0 : index
    %c145 = arith.constant 145 : index
    %80 = vector.load %arg5[%c0_51, %c0_52, %c145] : memref<2x8x512xf32, #tpu.memory_space<vmem>>, vector<1x8x256xf32>
    %81 = vector.shape_cast %80 : vector<1x8x256xf32> to vector<8x256xf32>
    %82 = arith.mulf %81, %27 : vector<8x256xf32>
    %c0_53 = arith.constant 0 : index
    %c64 = arith.constant 64 : index
    %c0_54 = arith.constant 0 : index
    %83 = vector.load %arg6[%c0_53, %c64, %c0_54] : memref<2x72x256xf32, #tpu.memory_space<vmem>>, vector<1x8x256xf32>
    %84 = vector.shape_cast %83 : vector<1x8x256xf32> to vector<8x256xf32>
    %85 = vector.shape_cast %82 : vector<8x256xf32> to vector<1x8x256xf32>
    tpu.vector_store %arg6[%c0_53, %c64, %c0_54], %85 {strides = array<i32>} : memref<2x72x256xf32, #tpu.memory_space<vmem>>, vector<1x8x256xf32>,
    %c0_55 = arith.constant 0 : index
    %c0_56 = arith.constant 0 : index
    %c0_57 = arith.constant 0 : index
    %86 = vector.load %arg6[%c0_55, %c0_56, %c0_57] : memref<2x72x256xf32, #tpu.memory_space<vmem>>, vector<1x72x256xf32>
    %87 = vector.shape_cast %86 : vector<1x72x256xf32> to vector<72x256xf32>
    %cst_58 = arith.constant dense<0.000000e+00> : vector<8x256xf32>
    %88 = tpu.matmul %28, %87, %cst_58 {dimension_numbers = #tpu.dot_dimension_numbers<[1], [0], [0], [1], [0, 0, 1, 1], [], []>} : vector<8x72xf32>, vector<72x256xf32>, vector<8x256xf32> -> vector<8x256xf32>
    %cst_59 = arith.constant 0.000000e+00 : f32
    %89 = vector.broadcast %cst_59 : f32 to vector<8x256xf32>
    %90 = arith.maximumf %88, %89 : vector<8x256xf32>
    %c0_60 = arith.constant 0 : index
    %c0_61 = arith.constant 0 : index
    %c128_62 = arith.constant 128 : index
    %91 = vector.load %arg5[%c0_60, %c0_61, %c128_62] : memref<2x8x512xf32, #tpu.memory_space<vmem>>, vector<1x8x256xf32>
    %92 = vector.shape_cast %91 : vector<1x8x256xf32> to vector<8x256xf32>
    %93 = vector.shape_cast %90 : vector<8x256xf32> to vector<1x8x256xf32>
    tpu.vector_store %arg5[%c0_60, %c0_61, %c128_62], %93 {strides = array<i32>} : memref<2x8x512xf32, #tpu.memory_space<vmem>>, vector<1x8x256xf32>,
    %c0_63 = arith.constant 0 : index
    %c0_64 = arith.constant 0 : index
    %c111_65 = arith.constant 111 : index
    %94 = vector.load %arg5[%c0_63, %c0_64, %c111_65] : memref<2x8x512xf32, #tpu.memory_space<vmem>>, vector<1x8x256xf32>
    %95 = vector.shape_cast %94 : vector<1x8x256xf32> to vector<8x256xf32>
    %96 = arith.mulf %95, %23 : vector<8x256xf32>
    %c0_66 = arith.constant 0 : index
    %c0_67 = arith.constant 0 : index
    %c0_68 = arith.constant 0 : index
    %97 = vector.load %arg6[%c0_66, %c0_67, %c0_68] : memref<2x72x256xf32, #tpu.memory_space<vmem>>, vector<1x8x256xf32>
    %98 = vector.shape_cast %97 : vector<1x8x256xf32> to vector<8x256xf32>
    %99 = vector.shape_cast %96 : vector<8x256xf32> to vector<1x8x256xf32>
    tpu.vector_store %arg6[%c0_66, %c0_67, %c0_68], %99 {strides = array<i32>} : memref<2x72x256xf32, #tpu.memory_space<vmem>>, vector<1x8x256xf32>,
    %c0_69 = arith.constant 0 : index
    %c0_70 = arith.constant 0 : index
    %c112_71 = arith.constant 112 : index
    %100 = vector.load %arg5[%c0_69, %c0_70, %c112_71] : memref<2x8x512xf32, #tpu.memory_space<vmem>>, vector<1x8x256xf32>
    %101 = vector.shape_cast %100 : vector<1x8x256xf32> to vector<8x256xf32>
    %c0_72 = arith.constant 0 : index
    %c8_73 = arith.constant 8 : index
    %c0_74 = arith.constant 0 : index
    %102 = vector.load %arg6[%c0_72, %c8_73, %c0_74] : memref<2x72x256xf32, #tpu.memory_space<vmem>>, vector<1x8x256xf32>
    %103 = vector.shape_cast %102 : vector<1x8x256xf32> to vector<8x256xf32>
    %104 = vector.shape_cast %101 : vector<8x256xf32> to vector<1x8x256xf32>
    tpu.vector_store %arg6[%c0_72, %c8_73, %c0_74], %104 {strides = array<i32>} : memref<2x72x256xf32, #tpu.memory_space<vmem>>, vector<1x8x256xf32>,
    %c0_75 = arith.constant 0 : index
    %c0_76 = arith.constant 0 : index
    %c113_77 = arith.constant 113 : index
    %105 = vector.load %arg5[%c0_75, %c0_76, %c113_77] : memref<2x8x512xf32, #tpu.memory_space<vmem>>, vector<1x8x256xf32>
    %106 = vector.shape_cast %105 : vector<1x8x256xf32> to vector<8x256xf32>
    %107 = arith.mulf %106, %27 : vector<8x256xf32>
    %c0_78 = arith.constant 0 : index
    %c16_79 = arith.constant 16 : index
    %c0_80 = arith.constant 0 : index
    %108 = vector.load %arg6[%c0_78, %c16_79, %c0_80] : memref<2x72x256xf32, #tpu.memory_space<vmem>>, vector<1x8x256xf32>
    %109 = vector.shape_cast %108 : vector<1x8x256xf32> to vector<8x256xf32>
    %110 = vector.shape_cast %107 : vector<8x256xf32> to vector<1x8x256xf32>
    tpu.vector_store %arg6[%c0_78, %c16_79, %c0_80], %110 {strides = array<i32>} : memref<2x72x256xf32, #tpu.memory_space<vmem>>, vector<1x8x256xf32>,
    %c0_81 = arith.constant 0 : index
    %c0_82 = arith.constant 0 : index
    %c127_83 = arith.constant 127 : index
    %111 = vector.load %arg5[%c0_81, %c0_82, %c127_83] : memref<2x8x512xf32, #tpu.memory_space<vmem>>, vector<1x8x256xf32>
    %112 = vector.shape_cast %111 : vector<1x8x256xf32> to vector<8x256xf32>
    %113 = arith.mulf %112, %23 : vector<8x256xf32>
    %c0_84 = arith.constant 0 : index
    %c24_85 = arith.constant 24 : index
    %c0_86 = arith.constant 0 : index
    %114 = vector.load %arg6[%c0_84, %c24_85, %c0_86] : memref<2x72x256xf32, #tpu.memory_space<vmem>>, vector<1x8x256xf32>
    %115 = vector.shape_cast %114 : vector<1x8x256xf32> to vector<8x256xf32>
    %116 = vector.shape_cast %113 : vector<8x256xf32> to vector<1x8x256xf32>
    tpu.vector_store %arg6[%c0_84, %c24_85, %c0_86], %116 {strides = array<i32>} : memref<2x72x256xf32, #tpu.memory_space<vmem>>, vector<1x8x256xf32>,
    %c0_87 = arith.constant 0 : index
    %c0_88 = arith.constant 0 : index
    %c128_89 = arith.constant 128 : index
    %117 = vector.load %arg5[%c0_87, %c0_88, %c128_89] : memref<2x8x512xf32, #tpu.memory_space<vmem>>, vector<1x8x256xf32>
    %118 = vector.shape_cast %117 : vector<1x8x256xf32> to vector<8x256xf32>
    %c0_90 = arith.constant 0 : index
    %c32_91 = arith.constant 32 : index
    %c0_92 = arith.constant 0 : index
    %119 = vector.load %arg6[%c0_90, %c32_91, %c0_92] : memref<2x72x256xf32, #tpu.memory_space<vmem>>, vector<1x8x256xf32>
    %120 = vector.shape_cast %119 : vector<1x8x256xf32> to vector<8x256xf32>
    %121 = vector.shape_cast %118 : vector<8x256xf32> to vector<1x8x256xf32>
    tpu.vector_store %arg6[%c0_90, %c32_91, %c0_92], %121 {strides = array<i32>} : memref<2x72x256xf32, #tpu.memory_space<vmem>>, vector<1x8x256xf32>,
    %c0_93 = arith.constant 0 : index
    %c0_94 = arith.constant 0 : index
    %c129_95 = arith.constant 129 : index
    %122 = vector.load %arg5[%c0_93, %c0_94, %c129_95] : memref<2x8x512xf32, #tpu.memory_space<vmem>>, vector<1x8x256xf32>
    %123 = vector.shape_cast %122 : vector<1x8x256xf32> to vector<8x256xf32>
    %124 = arith.mulf %123, %27 : vector<8x256xf32>
    %c0_96 = arith.constant 0 : index
    %c40_97 = arith.constant 40 : index
    %c0_98 = arith.constant 0 : index
    %125 = vector.load %arg6[%c0_96, %c40_97, %c0_98] : memref<2x72x256xf32, #tpu.memory_space<vmem>>, vector<1x8x256xf32>
    %126 = vector.shape_cast %125 : vector<1x8x256xf32> to vector<8x256xf32>
    %127 = vector.shape_cast %124 : vector<8x256xf32> to vector<1x8x256xf32>
    tpu.vector_store %arg6[%c0_96, %c40_97, %c0_98], %127 {strides = array<i32>} : memref<2x72x256xf32, #tpu.memory_space<vmem>>, vector<1x8x256xf32>,
    %c0_99 = arith.constant 0 : index
    %c0_100 = arith.constant 0 : index
    %c143_101 = arith.constant 143 : index
    %128 = vector.load %arg5[%c0_99, %c0_100, %c143_101] : memref<2x8x512xf32, #tpu.memory_space<vmem>>, vector<1x8x256xf32>
    %129 = vector.shape_cast %128 : vector<1x8x256xf32> to vector<8x256xf32>
    %130 = arith.mulf %129, %23 : vector<8x256xf32>
    %c0_102 = arith.constant 0 : index
    %c48_103 = arith.constant 48 : index
    %c0_104 = arith.constant 0 : index
    %131 = vector.load %arg6[%c0_102, %c48_103, %c0_104] : memref<2x72x256xf32, #tpu.memory_space<vmem>>, vector<1x8x256xf32>
    %132 = vector.shape_cast %131 : vector<1x8x256xf32> to vector<8x256xf32>
    %133 = vector.shape_cast %130 : vector<8x256xf32> to vector<1x8x256xf32>
    tpu.vector_store %arg6[%c0_102, %c48_103, %c0_104], %133 {strides = array<i32>} : memref<2x72x256xf32, #tpu.memory_space<vmem>>, vector<1x8x256xf32>,
    %c0_105 = arith.constant 0 : index
    %c0_106 = arith.constant 0 : index
    %c144_107 = arith.constant 144 : index
    %134 = vector.load %arg5[%c0_105, %c0_106, %c144_107] : memref<2x8x512xf32, #tpu.memory_space<vmem>>, vector<1x8x256xf32>
    %135 = vector.shape_cast %134 : vector<1x8x256xf32> to vector<8x256xf32>
    %c0_108 = arith.constant 0 : index
    %c56_109 = arith.constant 56 : index
    %c0_110 = arith.constant 0 : index
    %136 = vector.load %arg6[%c0_108, %c56_109, %c0_110] : memref<2x72x256xf32, #tpu.memory_space<vmem>>, vector<1x8x256xf32>
    %137 = vector.shape_cast %136 : vector<1x8x256xf32> to vector<8x256xf32>
    %138 = vector.shape_cast %135 : vector<8x256xf32> to vector<1x8x256xf32>
    tpu.vector_store %arg6[%c0_108, %c56_109, %c0_110], %138 {strides = array<i32>} : memref<2x72x256xf32, #tpu.memory_space<vmem>>, vector<1x8x256xf32>,
    %c0_111 = arith.constant 0 : index
    %c0_112 = arith.constant 0 : index
    %c145_113 = arith.constant 145 : index
    %139 = vector.load %arg5[%c0_111, %c0_112, %c145_113] : memref<2x8x512xf32, #tpu.memory_space<vmem>>, vector<1x8x256xf32>
    %140 = vector.shape_cast %139 : vector<1x8x256xf32> to vector<8x256xf32>
    %141 = arith.mulf %140, %27 : vector<8x256xf32>
    %c0_114 = arith.constant 0 : index
    %c64_115 = arith.constant 64 : index
    %c0_116 = arith.constant 0 : index
    %142 = vector.load %arg6[%c0_114, %c64_115, %c0_116] : memref<2x72x256xf32, #tpu.memory_space<vmem>>, vector<1x8x256xf32>
    %143 = vector.shape_cast %142 : vector<1x8x256xf32> to vector<8x256xf32>
    %144 = vector.shape_cast %141 : vector<8x256xf32> to vector<1x8x256xf32>
    tpu.vector_store %arg6[%c0_114, %c64_115, %c0_116], %144 {strides = array<i32>} : memref<2x72x256xf32, #tpu.memory_space<vmem>>, vector<1x8x256xf32>,
    %c0_117 = arith.constant 0 : index
    %c0_118 = arith.constant 0 : index
    %c0_119 = arith.constant 0 : index
    %145 = vector.load %arg6[%c0_117, %c0_118, %c0_119] : memref<2x72x256xf32, #tpu.memory_space<vmem>>, vector<1x72x256xf32>
    %146 = vector.shape_cast %145 : vector<1x72x256xf32> to vector<72x256xf32>
    %cst_120 = arith.constant dense<0.000000e+00> : vector<8x256xf32>
    %147 = tpu.matmul %29, %146, %cst_120 {dimension_numbers = #tpu.dot_dimension_numbers<[1], [0], [0], [1], [0, 0, 1, 1], [], []>} : vector<8x72xf32>, vector<72x256xf32>, vector<8x256xf32> -> vector<8x256xf32>
    %148 = arith.addf %31, %147 : vector<8x256xf32>
    %c0_121 = arith.constant 0 : index
    %c0_122 = arith.constant 0 : index
    %c0_123 = arith.constant 0 : index
    %149 = vector.load %arg4[%c0_121, %c0_122, %c0_123] : memref<1x8x256xf32, #tpu.memory_space<vmem>>, vector<1x8x256xf32>
    %150 = vector.shape_cast %149 : vector<1x8x256xf32> to vector<8x256xf32>
    %151 = vector.shape_cast %148 : vector<8x256xf32> to vector<1x8x256xf32>
    tpu.vector_store %arg4[%c0_121, %c0_122, %c0_123], %151 {strides = array<i32>} : memref<1x8x256xf32, #tpu.memory_space<vmem>>, vector<1x8x256xf32>,
    return
  }
  func.func @transform_0(%arg0: i32) -> (i32, i32, i32) {
    %c0_i32 = arith.constant 0 : i32
    %c0_i32_0 = arith.constant 0 : i32
    %c0_i32_1 = arith.constant 0 : i32
    return %arg0, %c0_i32, %c0_i32_0 : i32, i32, i32
  }
  func.func @transform_1(%arg0: i32) -> (i32, i32) {
    %c0_i32 = arith.constant 0 : i32
    %c0_i32_0 = arith.constant 0 : i32
    %c0_i32_1 = arith.constant 0 : i32
    return %c0_i32, %c0_i32_0 : i32, i32
  }
  func.func @transform_2(%arg0: i32) -> (i32, i32) {
    %c0_i32 = arith.constant 0 : i32
    %c0_i32_0 = arith.constant 0 : i32
    %c0_i32_1 = arith.constant 0 : i32
    return %c0_i32, %c0_i32_0 : i32, i32
  }
  func.func @transform_3(%arg0: i32) -> (i32, i32, i32) {
    %c0_i32 = arith.constant 0 : i32
    %c0_i32_0 = arith.constant 0 : i32
    %c0_i32_1 = arith.constant 0 : i32
    return %arg0, %c0_i32, %c0_i32_0 : i32, i32, i32
  }
}

</mosaic_0001>

<bundles_post_ra>
// kernel: resblock_forward.1
= control target key start
LH: loop header
LB: loop body
LE: loop exit
PB: predicated region body
PF: predicated region fallthrough
CT: control target
= control target key end

     0   :  { %s983_s12 = smov 0   ;;  %s1221_s0 = inlined_call_operand.vmem [shape: f32[2,8,256], index: 0, kind: input, shape index: {}]   ;;  %s1222_s1 = inlined_call_operand.vmem [shape: f32[8,72], index: 1, kind: input, shape index: {}]   ;;  %s1223_s2 = inlined_call_operand.vmem [shape: f32[8,72], index: 2, kind: input, shape index: {}]   ;;  %s1224_s3 = inlined_call_operand.vmem [shape: f32[2,8,256], index: 3, kind: output, shape index: {}]  }
   0x1 LB: > { %s798_s13 = sadd.s32 4294967295, %s952_s12   ;;  %p802_p0 = scmp.ge.s32.totalorder %s952_s12, 1  ;;  %s952_s12 = sphi %s983_s12, %s13_s12  }
   0x2   : > { %p137_p1 = scmp.lt.s32.totalorder %s952_s12, 3 }
   0x4   : > { %p138_p2 = pnand %p802_p0, %p137_p1 }
   0x5   : > { %s955_s14 = smov (!%p138_p2), 1   ;;  %s956_s15 = smov (!%p138_p2), 17  }
   0x6   : > { %141 = sbr.rel (%p138_p2) target bundleno = 710 (0x2c6), region = 32  ;;  %s957_s16 = smov (!%p138_p2), 113  }
   0x7   : > { %s958_s17 = smov (!%p138_p2), 127   ;;  %s959_s18 = smov (!%p138_p2), 15  }
   0x8   : > { %s960_s19 = smov (!%p138_p2), 111   ;;  %s961_s20 = smov (!%p138_p2), 112  }
   0x9   : > { %p161_p3 = scmp.lt.s32.totalorder (!%p138_p2), %s798_s13, 1  ;;  %s962_s25 = smov (!%p138_p2), 16  }
   0xb   : > { %v175_v0 = vlaneseq  ;;  %v954_v5 = vmov 0.0   ;;  %s1226_s13 = smov (!%p161_p3, %s798_s13), 1  ;;  %vm298_vm4 = vcmask 121856   ;;  %vm246_vm5 = vcmask 138240  }
   0xc   : > { %s817_s21 = sshll.u32 %s1226_s13, 4  ;;  %vm281_vm6 = vcmask 924672   ;;  %vm312_vm7 = vcmask 1039360   ;;  %vm329_vm8 = vcmask 7168   ;;  %vm229_vm9 = vcmask 908288  }
   0xd   : > { %v176_v1 = vand.u32 127, %v175_v0  ;;  %s165_s24 = scalar_lea.vmem %s1221_s0, %s817_s21  ;;  %vm410_vm10 = vcmask 916480   ;;  %vm265_vm11 = vcmask 130048   ;;  %vm464_vm12 = vcmask 588800   ;;  %s170_s5 = scalar_lea.vmem %s1224_s3, %s817_s21 }
   0xe   : > { %v1015_v12 = vld [vmem:[%s165_s24] sm:$0xff]  ;;  %v1017_v13 = vld [vmem:[%s165_s24 + $0x8] sm:$0xff] }
   0xf   : > { %v177_v2 = vadd.s32 128, %v176_v1  ;;  %v182_v3 = vand.u32 15, %v176_v1  ;;  %v866_v14 = vpack.i.bf16 %v1017_v13, %v1015_v12  ;;  %v886_v62 = vpack.i.bf16 %v1015_v12, %v954_v5 }
  0x11   : > { %v189_v4 = vand.u32 15, %v177_v2  ;;  %vm208_vm0 = vcmp.ne.s32.totalorder %v182_v3, 15  ;;  %vm202_vm2 = vcmp.ne.s32.totalorder %v182_v3, 0 }
  0x12   : > { %v809_v6 = vsel %vm208_vm0, 1.0, %v954_v5  ;;  %v807_v9 = vsel %vm202_vm2, 1.0, %v954_v5 }
  0x13   : > { %vm209_vm1 = vcmp.ne.s32.totalorder %v189_v4, 15  ;;  %vm203_vm3 = vcmp.ne.s32.totalorder %v189_v4, 0 }
  0x14   : > { %v810_v7 = vsel %vm209_vm1, 1.0, %v954_v5  ;;  %v808_v10 = vsel %vm203_vm3, 1.0, %v954_v5 }
  0x15   : > { %v846_v8 = vpack.i.bf16 %v810_v7, %v809_v6  ;;  %v851_v11 = vpack.i.bf16 %v808_v10, %v807_v9 }
  0x17   : > { %847 = vrot.lane.b32.xlu1 %v846_v8, %s955_s14  ;;  %837 = vrot.lane.b32.xlu0 %v846_v8, %s956_s15 }
  0x18   : > { %857 = vrot.lane.b32.xlu2 %v846_v8, %s957_s16 }
  0x1f   : > { %852 = vrot.lane.b32.xlu1 %v851_v11, %s958_s17  ;;  %842 = vrot.lane.b32.xlu0 %v851_v11, %s959_s18 }
  0x20   : > { %862 = vrot.lane.b32.xlu2 %v851_v11, %s960_s19 }
  0x27   : > { %408 = vrot.lane.b32.xlu0 %v954_v5, %s961_s20 }
  0x28   : > { %867 = vrot.lane.b32.xlu2 %v866_v14, %s961_s20 }
  0x72   : > { %v858_v26 = vpop.permute.xlu2 %857 }
  0x73   : > { %v1044_v32 = vunpack.i.h.bf16 %v858_v26  ;;  %v859_v35 = vunpack.i.l.bf16 %v858_v26 }
  0x75   : > { %v288_v40 = vmul.f32 %v1044_v32, %v1017_v13  ;;  %v1061_v42 = vsel %vm281_vm6, %v859_v35, %v1044_v32  ;;  %v1071_v47 = vmul.f32 0.0, %v859_v35 }
  0x76   : > { %v287_v48 = vmul.f32 %v1061_v42, %v1015_v12 }
  0x78   : > { %v896_v55 = vpack.i.bf16 %v287_v48, %v1071_v47 }
  0x7a   : > { %v863_v43 = vpop.permute.xlu2 %862 }
  0x7b   : > { %v1078_v49 = vunpack.i.h.bf16 %v863_v43  ;;  %v864_v50 = vunpack.i.l.bf16 %v863_v43 }
  0x7d   : > { %v1091_v56 = vsel %vm229_vm9, %v864_v50, %v1078_v49  ;;  %v1094_v59 = vmul.f32 0.0, %v864_v50  ;;  %v236_v63 = vmul.f32 %v1078_v49, %v1017_v13 }
  0x7e   : > { %v235_v60 = vmul.f32 %v1091_v56, %v1015_v12 }
  0x80   : > { %v901_v61 = vpack.i.bf16 %v235_v60, %v1094_v59 }
  0x82   : > { %v868_v0 = vpop.permute.xlu2 %867 }
  0x83   : > { %v870_v9 = vunpack.i.h.bf16 %v868_v0  ;;  %v869_v11 = vunpack.i.l.bf16 %v868_v0 }
  0x89   : > { %v848_v15 = vpop.permute.xlu1 %847  ;;  %v838_v16 = vpop.permute.xlu0 %837 }
  0x8a   : > { %v840_v17 = vunpack.i.h.bf16 %v838_v16  ;;  %v850_v19 = vunpack.i.h.bf16 %v848_v15  ;;  %v1026_v22 = vunpack.i.l.bf16 %v838_v16  ;;  %v1055_v39 = vunpack.i.l.bf16 %v848_v15 }
  0x8c   : > { %v1022_v18 = vmul.f32 0.0, %v840_v17  ;;  %v353_v27 = vmul.f32 0.0, %v850_v19  ;;  %v1040_v31 = vsel %vm246_vm5, %v1026_v22, %v840_v17  ;;  %v428_v37 = vmul.f32 %v1026_v22, %v1015_v12 }
  0x8d   : > { %v429_v38 = vmul.f32 %v1040_v31, %v1017_v13  ;;  %v1069_v46 = vsel %vm329_vm8, %v1055_v39, %v850_v19  ;;  %v351_v53 = vmul.f32 %v1055_v39, %v1015_v12 }
  0x8e   : > { %438 = vrot.lane.b32.xlu1 %v1022_v18, %s960_s19  ;;  %v352_v54 = vmul.f32 %v1069_v46, %v1017_v13 }
  0x8f   : > { %v871_v45 = vpack.i.bf16 %v429_v38, %v428_v37 }
  0x90   : > { %v881_v58 = vpack.i.bf16 %v352_v54, %v351_v53 }
  0x91   : > { %v853_v20 = vpop.permute.xlu1 %852  ;;  %v843_v21 = vpop.permute.xlu0 %842 }
  0x92   : > { %v1028_v23 = vunpack.i.h.bf16 %v853_v20  ;;  %v845_v24 = vunpack.i.h.bf16 %v843_v21  ;;  %v1030_v25 = vunpack.i.l.bf16 %v843_v21  ;;  %v854_v36 = vunpack.i.l.bf16 %v853_v20 }
  0x93   : > { %v411_v21 = vsel %vm410_vm10, %v869_v11, %v870_v9 }
  0x94   : > { %v382_v28 = vmul.f32 0.0, %v845_v24  ;;  %v1034_v29 = vsel %vm298_vm4, %v1030_v25, %v845_v24  ;;  %v319_v30 = vmul.f32 %v1028_v23, %v1017_v13  ;;  %v380_v33 = vmul.f32 %v1030_v25, %v1015_v12 }
  0x95   : > { %v381_v34 = vmul.f32 %v1034_v29, %v1017_v13  ;;  %v1065_v44 = vsel %vm312_vm7, %v854_v36, %v1028_v23  ;;  %v1080_v51 = vmul.f32 0.0, %v854_v36 }
  0x96   : > { %361 = vrot.lane.b32.xlu1 %v353_v27, %s958_s17  ;;  %390 = vrot.lane.b32.xlu2 %v382_v28, %s957_s16  ;;  %v318_v52 = vmul.f32 %v1065_v44, %v1015_v12 }
  0x97   : > { %327 = vrot.lane.b32.xlu0 %v319_v30, %s955_s14  ;;  %v876_v41 = vpack.i.bf16 %v381_v34, %v380_v33 }
  0x98   : > { %v891_v57 = vpack.i.bf16 %v318_v52, %v1080_v51 }
  0x99   : > { %v409_v1 = vpop.permute.xlu0 %408 }
  0x9a   : > { %v412_v24 = vsel %vm410_vm10, %v870_v9, %v409_v1 }
  0x9e   : > { %296 = vrot.lane.b32.xlu2 %v288_v40, %s959_s18  ;;  %877 = vrot.lane.b32.xlu1 %v876_v41, %s957_s16 }
  0x9f   : > { %872 = vrot.lane.b32.xlu0 %v871_v45, %s960_s19 }
  0xa6   : > { %892 = vrot.lane.b32.xlu2 %v891_v57, %s955_s14  ;;  %897 = vrot.lane.b32.xlu1 %v896_v55, %s959_s18 }
  0xa7   : > { %882 = vrot.lane.b32.xlu0 %v881_v58, %s958_s17 }
  0xae   : > { %902 = vrot.lane.b32.xlu2 %v901_v61, %s956_s15  ;;  %263 = vrot.lane.b32.xlu1 %v1017_v13, %s962_s25 }
  0xaf   : > { %887 = vrot.lane.b32.xlu0 %v886_v62, %s962_s25 }
  0xb6   : > { %670 = vrot.lane.b32.xlu2 %v1022_v18, %s960_s19  ;;  %649 = vrot.lane.b32.xlu1 %v954_v5, %s961_s20 }
  0xb7   : > { %244 = vrot.lane.b32.xlu0 %v236_v63, %s956_s15  ;;  %v214_v63 = vld [vmem:[%s1222_s1] sm:$0xff] }
  0xbe   : > { %610 = vrot.lane.b32.xlu2 %v353_v27, %s958_s17 }
  0xbf   : > { %631 = vrot.lane.b32.xlu0 %v382_v28, %s957_s16 }
  0xf0   : > { %v391_v3 = vpop.permute.xlu2 %390 }
  0xf8   : > { %v297_v7 = vpop.permute.xlu2 %296 }
 0x100   : > { %v439_v2 = vpop.permute.xlu1 %438  ;;  %v893_v20 = vpop.permute.xlu2 %892 }
 0x101   : > { %v895_v35 = vunpack.i.h.bf16 %v893_v20  ;;  %v894_v36 = vunpack.i.l.bf16 %v893_v20 }
 0x103   : > { %v330_v45 = vsel %vm329_vm8, %v894_v36, %v895_v35 }
 0x108   : > { %v362_v4 = vpop.permute.xlu1 %361  ;;  %v903_v43 = vpop.permute.xlu2 %902 }
 0x109   : > { %v328_v6 = vpop.permute.xlu0 %327  ;;  %v905_v52 = vunpack.i.h.bf16 %v903_v43  ;;  %v904_v55 = vunpack.i.l.bf16 %v903_v43 }
 0x10a   : > { %v331_v48 = vsel %vm329_vm8, %v895_v35, %v328_v6 }
 0x10b   : > { %v247_v0 = vsel %vm246_vm5, %v904_v55, %v905_v52 }
 0x110   : > { %v878_v8 = vpop.permute.xlu1 %877 }
 0x111   : > { %v873_v10 = vpop.permute.xlu0 %872  ;;  %v879_v16 = vunpack.i.l.bf16 %v878_v8  ;;  %v880_v17 = vunpack.i.h.bf16 %v878_v8 }
 0x112   : > { %v875_v14 = vunpack.i.h.bf16 %v873_v10  ;;  %v874_v15 = vunpack.i.l.bf16 %v873_v10 }
 0x113   : > { %v392_v26 = vsel %vm281_vm6, %v879_v16, %v880_v17  ;;  %v393_v27 = vsel %vm281_vm6, %v880_v17, %v391_v3 }
 0x114   : > { %v440_v18 = vsel %vm229_vm9, %v874_v15, %v875_v14  ;;  %v441_v19 = vsel %vm229_vm9, %v875_v14, %v439_v2 }
 0x115   : > { %475 = vmatpush.msra.mxu0 %v440_v18  ;;  %495 = vmatpush.msra.mxu1 %v441_v19 }
 0x117   : > { %476 = vmatpush.msra.mxu0 %v411_v21  ;;  %496 = vmatpush.msra.mxu1 %v412_v24 }
 0x118   : > { %v898_v30 = vpop.permute.xlu1 %897 }
 0x119   : > { %497 = vmatpush.msra.mxu1 %v393_v27  ;;  %v883_v28 = vpop.permute.xlu0 %882  ;;  %477 = vmatpush.msra.mxu0 %v392_v26  ;;  %v899_v37 = vunpack.i.l.bf16 %v898_v30  ;;  %v900_v41 = vunpack.i.h.bf16 %v898_v30 }
 0x11a   : > { %v885_v33 = vunpack.i.h.bf16 %v883_v28  ;;  %v884_v34 = vunpack.i.l.bf16 %v883_v28 }
 0x11b   : > { %v299_v50 = vsel %vm298_vm4, %v899_v37, %v900_v41  ;;  %v300_v60 = vsel %vm298_vm4, %v900_v41, %v297_v7 }
 0x11c   : > { %v363_v38 = vsel %vm312_vm7, %v884_v34, %v885_v33  ;;  %v364_v40 = vsel %vm312_vm7, %v885_v33, %v362_v4 }
 0x11d   : > { %478 = vmatpush.msra.mxu0 %v363_v38  ;;  %498 = vmatpush.msra.mxu1 %v364_v40 }
 0x11f   : > { %479 = vmatpush.msra.mxu0 %v1015_v12  ;;  %499 = vmatpush.msra.mxu1 %v1017_v13 }
 0x120   : > { %v264_v54 = vpop.permute.xlu1 %263 }
 0x121   : > { %v888_v53 = vpop.permute.xlu0 %887  ;;  %480 = vmatpush.msra.mxu0 %v330_v45  ;;  %500 = vmatpush.msra.mxu1 %v331_v48 }
 0x122   : > { %v890_v57 = vunpack.i.h.bf16 %v888_v53  ;;  %v889_v58 = vunpack.i.l.bf16 %v888_v53 }
 0x123   : > { %481 = vmatpush.msra.mxu0 %v299_v50  ;;  %501 = vmatpush.msra.mxu1 %v300_v60 }
 0x124   : > { %v266_v61 = vsel %vm265_vm11, %v889_v58, %v890_v57  ;;  %v267_v62 = vsel %vm265_vm11, %v890_v57, %v264_v54 }
 0x125   : > { %482 = vmatpush.msra.mxu0 %v266_v61  ;;  %502 = vmatpush.msra.mxu1 %v267_v62 }
 0x127   : > { %483 = vmatpush.msra.mxu0 %v247_v0 }
 0x128   : > { %811 = vmatmul.msk.f32.vlgmr.msra.gmra.mxu0 %vm464_vm12, %v214_v63  ;;  %v650_v19 = vpop.permute.xlu1 %649 }
 0x129   : > { %v245_v1 = vpop.permute.xlu0 %244 }
 0x12a   : > { %v248_v2 = vsel %vm246_vm5, %v905_v52, %v245_v1 }
 0x12b   : > { %503 = vmatpush.msra.mxu1 %v248_v2 }
 0x12c   : > { %812 = vmatmul.msk.f32.vlgmr.msra.gmra.mxu1 %vm464_vm12, %v214_v63 }
 0x131   : > { %v632_v20 = vpop.permute.xlu0 %631 }
 0x1a5   : > { %v485_v3 = vpop.f32.mrf.mxu0 }
 0x1a6   : > { %v1140_v4 = vmax.f32 %v485_v3, 0.0 }
 0x1a8   : > { %v911_v6 = vpack.i.bf16 %v1140_v4, %v954_v5  ;;  %v621_v10 = vmul.f32 %v1030_v25, %v1140_v4  ;;  %v660_v15 = vmul.f32 %v1026_v22, %v1140_v4  ;;  %v576_v17 = vmul.f32 %v1140_v4, %v1065_v44 }
 0x1a9   : > { %v505_v7 = vpop.f32.mrf.mxu1  ;;  %v555_v25 = vmul.f32 %v1140_v4, %v1061_v42  ;;  %v600_v18 = vmul.f32 %v1055_v39, %v1140_v4 }
 0x1aa   : > { %v1144_v8 = vmax.f32 %v505_v7, 0.0  ;;  %912 = vrot.lane.b32.xlu1 %v911_v6, %s962_s25 }
 0x1ab   : > { %v936_v22 = vpack.i.bf16 %v555_v25, %v1071_v47  ;;  %v516_v47 = vmul.f32 %v1140_v4, %v1091_v56 }
 0x1ac   : > { %v906_v9 = vpack.i.bf16 %v1144_v8, %v1140_v4  ;;  %v622_v11 = vmul.f32 %v1144_v8, %v1034_v29  ;;  %v661_v14 = vmul.f32 %v1144_v8, %v1040_v31  ;;  %v931_v29 = vpack.i.bf16 %v576_v17, %v1080_v51  ;;  %v671_v51 = vpop.permute.xlu2 %670 }
 0x1ad   : > { %v601_v31 = vmul.f32 %v1144_v8, %v1069_v46  ;;  %v556_v42 = vmul.f32 %v1044_v32, %v1144_v8  ;;  %v577_v46 = vmul.f32 %v1028_v23, %v1144_v8  ;;  %v941_v39 = vpack.i.bf16 %v516_v47, %v1094_v59 }
 0x1ae   : > { %907 = vrot.lane.b32.xlu0 %v906_v9, %s961_s20  ;;  %v921_v5 = vpack.i.bf16 %v622_v11, %v621_v10  ;;  %v916_v16 = vpack.i.bf16 %v661_v14, %v660_v15  ;;  %v517_v32 = vmul.f32 %v1078_v49, %v1144_v8  ;;  %v215_v11 = vld [vmem:[%s1223_s2] sm:$0xff] }
 0x1af   : > { %v926_v44 = vpack.i.bf16 %v601_v31, %v600_v18 }
 0x1b0   : > { %922 = vrot.lane.b32.xlu2 %v921_v5, %s957_s16 }
 0x1b2   : > { %917 = vrot.lane.b32.xlu1 %v916_v16, %s960_s19 }
 0x1b4   : > { %v611_v21 = vpop.permute.xlu2 %610 }
 0x1b6   : > { %932 = vrot.lane.b32.xlu0 %v931_v29, %s955_s14 }
 0x1b8   : > { %937 = vrot.lane.b32.xlu2 %v936_v22, %s959_s18 }
 0x1ba   : > { %927 = vrot.lane.b32.xlu1 %v926_v44, %s958_s17 }
 0x1be   : > { %564 = vrot.lane.b32.xlu0 %v556_v42, %s959_s18 }
 0x1c0   : > { %543 = vrot.lane.b32.xlu2 %v1144_v8, %s962_s25 }
 0x1c2   : > { %585 = vrot.lane.b32.xlu1 %v577_v46, %s955_s14 }
 0x1c6   : > { %942 = vrot.lane.b32.xlu0 %v941_v39, %s956_s15 }
 0x1ca   : > { %525 = vrot.lane.b32.xlu1 %v517_v32, %s956_s15 }
 0x20a   : > { %v923_v26 = vpop.permute.xlu2 %922 }
 0x20b   : > { %v925_v59 = vunpack.i.h.bf16 %v923_v26  ;;  %v924_v34 = vunpack.i.l.bf16 %v923_v26 }
 0x20d   : > { %v633_v40 = vsel %vm281_vm6, %v924_v34, %v925_v59  ;;  %v634_v41 = vsel %vm281_vm6, %v925_v59, %v632_v20 }
 0x212   : > { %v938_v50 = vpop.permute.xlu2 %937 }
 0x213   : > { %v940_v58 = vunpack.i.h.bf16 %v938_v50  ;;  %v939_v60 = vunpack.i.l.bf16 %v938_v50 }
 0x215   : > { %v566_v1 = vsel %vm298_vm4, %v939_v60, %v940_v58 }
 0x21a   : > { %v544_v7 = vpop.permute.xlu2 %543 }
 0x21c   : > { %v913_v24 = vpop.permute.xlu1 %912 }
 0x21d   : > { %v915_v61 = vunpack.i.h.bf16 %v913_v24  ;;  %v914_v62 = vunpack.i.l.bf16 %v913_v24 }
 0x21f   : > { %v545_v3 = vsel %vm265_vm11, %v914_v62, %v915_v61  ;;  %v546_v10 = vsel %vm265_vm11, %v915_v61, %v544_v7 }
 0x220   : > { %v908_v23 = vpop.permute.xlu0 %907 }
 0x221   : > { %v910_v56 = vunpack.i.h.bf16 %v908_v23  ;;  %v909_v28 = vunpack.i.l.bf16 %v908_v23 }
 0x223   : > { %v651_v37 = vsel %vm410_vm10, %v909_v28, %v910_v56  ;;  %v652_v38 = vsel %vm410_vm10, %v910_v56, %v650_v19 }
 0x224   : > { %v918_v27 = vpop.permute.xlu1 %917 }
 0x225   : > { %v920_v30 = vunpack.i.h.bf16 %v918_v27  ;;  %v919_v33 = vunpack.i.l.bf16 %v918_v27 }
 0x227   : > { %v672_v35 = vsel %vm229_vm9, %v919_v33, %v920_v30  ;;  %v673_v49 = vsel %vm229_vm9, %v920_v30, %v671_v51 }
 0x228   : > { %706 = vmatpush.msra.mxu2 %v672_v35  ;;  %726 = vmatpush.msra.mxu3 %v673_v49  ;;  %v933_v36 = vpop.permute.xlu0 %932 }
 0x229   : > { %v935_v52 = vunpack.i.h.bf16 %v933_v36  ;;  %v934_v53 = vunpack.i.l.bf16 %v933_v36 }
 0x22a   : > { %707 = vmatpush.msra.mxu2 %v651_v37  ;;  %727 = vmatpush.msra.mxu3 %v652_v38 }
 0x22b   : > { %v587_v63 = vsel %vm329_vm8, %v934_v53, %v935_v52 }
 0x22c   : > { %708 = vmatpush.msra.mxu2 %v633_v40  ;;  %728 = vmatpush.msra.mxu3 %v634_v41  ;;  %v928_v43 = vpop.permute.xlu1 %927 }
 0x22d   : > { %v930_v45 = vunpack.i.h.bf16 %v928_v43  ;;  %v929_v48 = vunpack.i.l.bf16 %v928_v43 }
 0x22f   : > { %v612_v54 = vsel %vm312_vm7, %v929_v48, %v930_v45  ;;  %v613_v55 = vsel %vm312_vm7, %v930_v45, %v611_v21 }
 0x230   : > { %709 = vmatpush.msra.mxu2 %v612_v54  ;;  %729 = vmatpush.msra.mxu3 %v613_v55  ;;  %v565_v57 = vpop.permute.xlu0 %564 }
 0x231   : > { %v567_v6 = vsel %vm298_vm4, %v940_v58, %v565_v57 }
 0x232   : > { %710 = vmatpush.msra.mxu2 %v1140_v4  ;;  %730 = vmatpush.msra.mxu3 %v1144_v8 }
 0x234   : > { %v586_v0 = vpop.permute.xlu1 %585  ;;  %711 = vmatpush.msra.mxu2 %v587_v63 }
 0x235   : > { %v588_v2 = vsel %vm329_vm8, %v935_v52, %v586_v0 }
 0x236   : > { %712 = vmatpush.msra.mxu2 %v566_v1  ;;  %731 = vmatpush.msra.mxu3 %v588_v2 }
 0x238   : > { %713 = vmatpush.msra.mxu2 %v545_v3  ;;  %732 = vmatpush.msra.mxu3 %v567_v6  ;;  %v943_v4 = vpop.permute.xlu0 %942 }
 0x239   : > { %v945_v8 = vunpack.i.h.bf16 %v943_v4  ;;  %v944_v9 = vunpack.i.l.bf16 %v943_v4 }
 0x23a   : > { %733 = vmatpush.msra.mxu3 %v546_v10 }
 0x23b   : > { %v527_v14 = vsel %vm246_vm5, %v944_v9, %v945_v8 }
 0x23c   : > { %v526_v5 = vpop.permute.xlu1 %525  ;;  %714 = vmatpush.msra.mxu2 %v527_v14 }
 0x23d   : > { %v528_v15 = vsel %vm246_vm5, %v945_v8, %v526_v5  ;;  %813 = vmatmul.msk.f32.vlgmr.msra.gmra.mxu2 %vm464_vm12, %v215_v11 }
 0x23e   : > { %734 = vmatpush.msra.mxu3 %v528_v15 }
 0x23f   : > { %814 = vmatmul.msk.f32.vlgmr.msra.gmra.mxu3 %vm464_vm12, %v215_v11 }
 0x2c0   : > { %v716_v16 = vpop.f32.mrf.mxu2 }
 0x2c1   : > { %v739_v17 = vadd.f32 %v716_v16, %v1015_v12 }
 0x2c2   : > { %v736_v25 = vpop.f32.mrf.mxu3 }
 0x2c3   : > { %741 = vst [vmem:[%s170_s5] sm:$0xff] %v739_v17  ;;  %v740_v29 = vadd.f32 %v736_v25, %v1017_v13 }
 0x2c5   : > { %742 = vst [vmem:[%s170_s5 + $0x8] sm:$0xff] %v740_v29 }
 0x2c6 PF: > { %s13_s12 = sadd.s32 1, %s952_s12  }
 0x2c7   : > { %p10_p4 = scmp.ge.s32.totalorder %s13_s12, 4  }
 0x2c9   :  { %12 = sbr.rel (!%p10_p4) target bundleno = 1 (0x1), region = 62 }

</bundles_post_ra>
